<compile_context>
chip_gen: v7x
topology: tpu7x:2x2x1
jax: 0.10.0
libtpu: 0.0.40
codegen_flags: <defaults>
</compile_context>

<pallas_src>
import functools

import jax
import jax.numpy as jnp
from jax.experimental import pallas as pl
from jax.experimental.pallas import tpu as pltpu


def _round_up(x, m):
    return ((x + m - 1) // m) * m


def _pick_m_tile(m):
    # Full extent for small M (block == array dim, no (8,128) issue),
    # otherwise MXU-friendly 256-row tiles (ragged edge handled by Pallas).
    return m if m <= 256 else 256


def _pick_n_tile(tw_pad):
    for tn in (256, 128):
        if tw_pad % tn == 0:
            return tn
    return tw_pad  # unreachable: tw_pad is a multiple of 128


def _pick_k_tile(nf):
    # K tile must divide nf exactly so no garbage enters the reduction.
    if nf <= 2048:
        return nf
    for tk in (2048, 1024, 512, 256, 128):
        if nf % tk == 0:
            return tk
    return nf


def _linear_bias_kernel(x_ref, w_ref, b_ref, o_ref, acc_ref, *, k_axis):
    """o = x @ w + b, accumulated over the K grid axis in f32 scratch."""
    k = pl.program_id(k_axis)

    @pl.when(k == 0)
    def _():
        acc_ref[...] = jnp.zeros_like(acc_ref)

    acc_ref[...] += jnp.dot(
        x_ref[...], w_ref[...], preferred_element_type=jnp.float32
    )

    @pl.when(k == pl.num_programs(k_axis) - 1)
    def _():
        o_ref[...] = (acc_ref[...] + b_ref[...].astype(jnp.float32)).astype(
            o_ref.dtype
        )


@functools.partial(jax.jit, static_argnames=("individual",))
def flatten_head_forward(x, weight, bias, *, individual):
    """Forward pass of Flatten_Head.

    Args:
      x:      [B, n_vars, d_model, patch_num]
      weight: [n_vars, nf, tw] if individual else [1, nf, tw]
      bias:   [n_vars, 1,  tw] if individual else [1, 1,  tw]
    Returns:
      [B, n_vars, tw]
    """
    B, n_vars, d_model, patch_num = x.shape
    nf = d_model * patch_num
    tw = weight.shape[-1]
    out_dtype = x.dtype

    # Lane-dense output: pad target_window up to a multiple of 128 (zero
    # columns in weight/bias), slice padded columns off at the end.
    tw_pad = _round_up(tw, 128)
    if tw_pad != tw:
        weight = jnp.pad(weight, ((0, 0), (0, 0), (0, tw_pad - tw)))
        bias = jnp.pad(bias, ((0, 0), (0, 0), (0, tw_pad - tw)))
    tn = _pick_n_tile(tw_pad)

    if not individual:
        # ---- Shared head: fold (B, n_vars) into the matmul M dimension. ----
        M = B * n_vars
        x2 = x.reshape(M, nf)          # contiguous collapse: no HBM copy
        w2 = weight[0]                 # (nf, tw_pad)
        b2 = bias[0]                   # (1,  tw_pad)
        tm = _pick_m_tile(M)
        tk = _pick_k_tile(nf)
        grid = (pl.cdiv(M, tm), tw_pad // tn, nf // tk)

        out = pl.pallas_call(
            functools.partial(_linear_bias_kernel, k_axis=2),
            out_shape=jax.ShapeDtypeStruct((M, tw_pad), out_dtype),
            grid_spec=pltpu.PrefetchScalarGridSpec(
                num_scalar_prefetch=0,
                grid=grid,
                in_specs=[
                    pl.BlockSpec((tm, tk), lambda i, j, k: (i, k)),
                    pl.BlockSpec((tk, tn), lambda i, j, k: (k, j)),
                    pl.BlockSpec((1, tn), lambda i, j, k: (0, j)),
                ],
                out_specs=pl.BlockSpec((tm, tn), lambda i, j, k: (i, j)),
                scratch_shapes=[pltpu.VMEM((tm, tn), jnp.float32)],
            ),
            compiler_params=pltpu.CompilerParams(
                dimension_semantics=("parallel", "parallel", "arbitrary"),
            ),
            cost_estimate=pl.CostEstimate(
                flops=2 * M * nf * tw_pad,
                transcendentals=0,
                bytes_accessed=(
                    x2.size * x2.dtype.itemsize
                    + w2.size * w2.dtype.itemsize
                    + b2.size * b2.dtype.itemsize
                    + M * tw_pad * jnp.dtype(out_dtype).itemsize
                ),
            ),
        )(x2, w2, b2)
        out = out.reshape(B, n_vars, tw_pad)

    else:
        # ---- Individual heads: no transpose of x.  Variable v's features ----
        # are the contiguous, lane-aligned column block [v*nf_pad,(v+1)*nf_pad)
        # of x.reshape(B, n_vars*nf_pad); the n_vars grid axis is just a
        # column-block offset in the index_map.
        nf_pad = _round_up(nf, 128)
        x3 = x.reshape(B, n_vars, nf)  # contiguous collapse: no HBM copy
        if nf_pad != nf:
            # Rare path (nf not 128-aligned): zero-pad features so column
            # blocks stay lane-aligned; zero rows in W contribute nothing.
            x3 = jnp.pad(x3, ((0, 0), (0, 0), (0, nf_pad - nf)))
            weight = jnp.pad(weight, ((0, 0), (0, nf_pad - nf), (0, 0)))
        x2 = x3.reshape(B, n_vars * nf_pad)   # contiguous collapse

        tb = _pick_m_tile(B)
        tk = _pick_k_tile(nf_pad)
        kt = nf_pad // tk                     # K blocks per variable
        jt = tw_pad // tn                     # N blocks per variable
        grid = (pl.cdiv(B, tb), n_vars, jt, kt)

        out = pl.pallas_call(
            functools.partial(_linear_bias_kernel, k_axis=3),
            out_shape=jax.ShapeDtypeStruct((B, n_vars * tw_pad), out_dtype),
            grid_spec=pltpu.PrefetchScalarGridSpec(
                num_scalar_prefetch=0,
                grid=grid,
                in_specs=[
                    pl.BlockSpec((tb, tk), lambda b, v, j, k: (b, v * kt + k)),
                    pl.BlockSpec((None, tk, tn), lambda b, v, j, k: (v, k, j)),
                    pl.BlockSpec((None, 1, tn), lambda b, v, j, k: (v, 0, j)),
                ],
                out_specs=pl.BlockSpec(
                    (tb, tn), lambda b, v, j, k: (b, v * jt + j)
                ),
                scratch_shapes=[pltpu.VMEM((tb, tn), jnp.float32)],
            ),
            compiler_params=pltpu.CompilerParams(
                dimension_semantics=(
                    "parallel", "parallel", "parallel", "arbitrary",
                ),
            ),
            cost_estimate=pl.CostEstimate(
                flops=2 * B * n_vars * nf_pad * tw_pad,
                transcendentals=0,
                bytes_accessed=(
                    x2.size * x2.dtype.itemsize
                    + weight.size * weight.dtype.itemsize
                    + bias.size * bias.dtype.itemsize
                    + B * n_vars * tw_pad * jnp.dtype(out_dtype).itemsize
                ),
            ),
        )(x2, weight, bias)
        out = out.reshape(B, n_vars, tw_pad)

    if tw_pad != tw:
        out = out[..., :tw]
    return out
    # TODO(synk): training-mode dropout (head_dropout > 0) not implemented;
    # forward matches the module in eval mode / p=0 (identity).


def init_params(key, n_vars, nf, target_window, individual, dtype=jnp.float32):
    """Synthetic init; shapes match nn.Linear(nf, target_window) (transposed W)."""
    n_heads = n_vars if individual else 1
    kw, kb = jax.random.split(key)
    bound = 1.0 / jnp.sqrt(jnp.float32(nf))
    weight = jax.random.uniform(
        kw, (n_heads, nf, target_window), jnp.float32, -bound, bound
    ).astype(dtype)
    bias = jax.random.uniform(
        kb, (n_heads, 1, target_window), jnp.float32, -bound, bound
    ).astype(dtype)
    return weight, bias


def reference_forward(x, weight, bias, individual):
    B, n_vars, d_model, patch_num = x.shape
    nf = d_model * patch_num
    z = x.reshape(B, n_vars, nf)  # Flatten(start_dim=-2)
    if individual:
        y = jnp.einsum("bvn,vnt->bvt", z, weight) + bias[None, :, 0, :]
    else:
        y = jnp.einsum("bvn,nt->bvt", z, weight[0]) + bias[0, 0][None, None, :]
    return y  # dropout(p=0) is identity


if __name__ == "__main__":
    key = jax.random.PRNGKey(0)
    ok = True

    # (B, n_vars, d_model, patch_num, target_window); second case exercises
    # the nf-not-multiple-of-128 padding path.
    cases = [
        (2, 4, 16, 8, 32),
        (2, 4, 12, 5, 32),
    ]

    for ci, (B, n_vars, d_model, patch_num, target_window) in enumerate(cases):
        nf = d_model * patch_num
        kx, kp1, kp2, key = jax.random.split(key, 4)
        x = jax.random.normal(kx, (B, n_vars, d_model, patch_num), jnp.float32)

        for individual, kp in ((False, kp1), (True, kp2)):
            weight, bias = init_params(kp, n_vars, nf, target_window, individual)
            y = flatten_head_forward(x, weight, bias, individual=individual)
            y = jax.block_until_ready(y)
            y_ref = reference_forward(x, weight, bias, individual)
            if y.shape != (B, n_vars, target_window):
                ok = False
            if not jnp.allclose(y, y_ref, atol=1e-5, rtol=1e-5):
                ok = False

    if ok:
        print("KERNEL_OK")
</pallas_src>

<mosaic_0001>
module attributes {stable_mosaic.version = 11 : i64} {
  func.func @_linear_bias_kernel(%arg0: i32, %arg1: i32, %arg2: i32, %arg3: memref<8x128xf32, #tpu.memory_space<vmem>>, %arg4: memref<128x128xf32, #tpu.memory_space<vmem>>, %arg5: memref<1x128xf32, #tpu.memory_space<vmem>>, %arg6: memref<8x128xf32, #tpu.memory_space<vmem>>, %arg7: memref<8x128xf32, #tpu.memory_space<vmem>>) attributes {dimension_semantics = [#tpu.dimension_semantics<parallel>, #tpu.dimension_semantics<parallel>, #tpu.dimension_semantics<arbitrary>], iteration_bounds = array<i64: 1, 1, 1>, scalar_prefetch = 0 : i64, scratch_operands = 1 : i64, tpu.core_type = #tpu.core_type<tc>, window_params = [{transform_indices = @transform_0, window_bounds = array<i64: 8, 128>}, {transform_indices = @transform_1, window_bounds = array<i64: 128, 128>}, {transform_indices = @transform_2, window_bounds = array<i64: 1, 128>}, {transform_indices = @transform_3, window_bounds = array<i64: 8, 128>}]} {
    %c0_i32 = arith.constant 0 : i32
    %0 = arith.cmpi eq, %arg2, %c0_i32 : i32
    %1 = arith.extui %0 : i1 to i32
    %c0_i32_0 = arith.constant 0 : i32
    %2 = arith.cmpi ne, %1, %c0_i32_0 : i32
    scf.if %2 {
      %cst_10 = arith.constant 0.000000e+00 : f32
      %12 = vector.broadcast %cst_10 : f32 to vector<8x128xf32>
      %c0_11 = arith.constant 0 : index
      %c0_12 = arith.constant 0 : index
      %13 = vector.load %arg7[%c0_11, %c0_12] : memref<8x128xf32, #tpu.memory_space<vmem>>, vector<8x128xf32>
      tpu.vector_store %arg7[%c0_11, %c0_12], %12 {strides = array<i32>} : memref<8x128xf32, #tpu.memory_space<vmem>>, vector<8x128xf32>,
    } else {
    }
    %c0 = arith.constant 0 : index
    %c0_1 = arith.constant 0 : index
    %3 = vector.load %arg7[%c0, %c0_1] : memref<8x128xf32, #tpu.memory_space<vmem>>, vector<8x128xf32>
    %c0_2 = arith.constant 0 : index
    %c0_3 = arith.constant 0 : index
    %4 = vector.load %arg3[%c0_2, %c0_3] : memref<8x128xf32, #tpu.memory_space<vmem>>, vector<8x128xf32>
    %c0_4 = arith.constant 0 : index
    %c0_5 = arith.constant 0 : index
    %5 = vector.load %arg4[%c0_4, %c0_5] : memref<128x128xf32, #tpu.memory_space<vmem>>, vector<128x128xf32>
    %cst = arith.constant dense<0.000000e+00> : vector<8x128xf32>
    %6 = tpu.matmul %4, %5, %cst {dimension_numbers = #tpu.dot_dimension_numbers<[1], [0], [0], [1], [0, 0, 1, 1], [], []>} : vector<8x128xf32>, vector<128x128xf32>, vector<8x128xf32> -> vector<8x128xf32>
    %7 = arith.addf %3, %6 : vector<8x128xf32>
    %c0_6 = arith.constant 0 : index
    %c0_7 = arith.constant 0 : index
    %8 = vector.load %arg7[%c0_6, %c0_7] : memref<8x128xf32, #tpu.memory_space<vmem>>, vector<8x128xf32>
    tpu.vector_store %arg7[%c0_6, %c0_7], %7 {strides = array<i32>} : memref<8x128xf32, #tpu.memory_space<vmem>>, vector<8x128xf32>,
    %c0_i32_8 = arith.constant 0 : i32
    %9 = arith.cmpi eq, %arg2, %c0_i32_8 : i32
    %10 = arith.extui %9 : i1 to i32
    %c0_i32_9 = arith.constant 0 : i32
    %11 = arith.cmpi ne, %10, %c0_i32_9 : i32
    scf.if %11 {
      %c0_10 = arith.constant 0 : index
      %c0_11 = arith.constant 0 : index
      %12 = vector.load %arg7[%c0_10, %c0_11] : memref<8x128xf32, #tpu.memory_space<vmem>>, vector<8x128xf32>
      %c0_12 = arith.constant 0 : index
      %c0_13 = arith.constant 0 : index
      %13 = vector.load %arg5[%c0_12, %c0_13] : memref<1x128xf32, #tpu.memory_space<vmem>>, vector<1x128xf32>
      %14 = vector.broadcast %13 : vector<1x128xf32> to vector<8x128xf32>
      %15 = arith.addf %12, %14 : vector<8x128xf32>
      %c0_14 = arith.constant 0 : index
      %c0_15 = arith.constant 0 : index
      %16 = vector.load %arg6[%c0_14, %c0_15] : memref<8x128xf32, #tpu.memory_space<vmem>>, vector<8x128xf32>
      tpu.vector_store %arg6[%c0_14, %c0_15], %15 {strides = array<i32>} : memref<8x128xf32, #tpu.memory_space<vmem>>, vector<8x128xf32>,
    } else {
    }
    return
  }
  func.func @transform_0(%arg0: i32, %arg1: i32, %arg2: i32) -> (i32, i32) {
    %c0_i32 = arith.constant 0 : i32
    return %arg0, %arg2 : i32, i32
  }
  func.func @transform_1(%arg0: i32, %arg1: i32, %arg2: i32) -> (i32, i32) {
    %c0_i32 = arith.constant 0 : i32
    return %arg2, %arg1 : i32, i32
  }
  func.func @transform_2(%arg0: i32, %arg1: i32, %arg2: i32) -> (i32, i32) {
    %c0_i32 = arith.constant 0 : i32
    %c0_i32_0 = arith.constant 0 : i32
    return %c0_i32, %arg1 : i32, i32
  }
  func.func @transform_3(%arg0: i32, %arg1: i32, %arg2: i32) -> (i32, i32) {
    %c0_i32 = arith.constant 0 : i32
    return %arg0, %arg1 : i32, i32
  }
}

</mosaic_0001>

<bundles_post_ra>
// kernel: flatten_head_forward.1
= control target key start
LH: loop header
LB: loop body
LE: loop exit
PB: predicated region body
PF: predicated region fallthrough
CT: control target
= control target key end

     0   :  { %v242_v3 = vmov 0.0|0.0   ;;  %vm243_vm0 = vmmov 0   ;;  %v244_v6 = vmov 0.0   ;;  %s332_s0 = inlined_call_operand.vmem [shape: f32[8,128], index: 0, kind: input, shape index: {}]   ;;  %s333_s1 = inlined_call_operand.vmem [shape: f32[128,128], index: 1, kind: input, shape index: {}]   ;;  %s334_s2 = inlined_call_operand.vmem [shape: f32[1,128], index: 2, kind: input, shape index: {}]   ;;  %s335_s3 = inlined_call_operand.hbm [shape: f32[8,128], index: 3, kind: output, shape index: {}]  }
   0x1   :  { %v22_v0 = vld [vmem:[%s333_s1] sm:$0xff]  ;;  %v23_v1 = vld [vmem:[%s333_s1 + $0x8] sm:$0xff]  ;;  %v24_v2 = vld [vmem:[%s333_s1 + $0x10] sm:$0xff]  ;;  %190 = vmatprep.subr.bf16.mxu0 %v242_v3  ;;  %187 = vmatprep.mubr.msk.f32.mxu0 %vm243_vm0, %v244_v6 }
   0x2   :  { %v191_v4 = vpack.c.bf16 %v23_v1, %v22_v0  ;;  %v25_v5 = vld [vmem:[%s333_s1 + $0x18] sm:$0xff]  ;;  %v26_v8 = vld [vmem:[%s333_s1 + $0x20] sm:$0xff]  ;;  %v27_v9 = vld [vmem:[%s333_s1 + $0x28] sm:$0xff] }
   0x3   :  { %v194_v7 = vpack.c.bf16 %v25_v5, %v24_v2 }
   0x4   :  { %192 = vmatpush3.bf16.msra.mxu0 %v191_v4 }
   0x5   :  { %193 = vmatprep.subr.bf16.mxu0 %v242_v3 }
   0x6   :  { %8 = vsyncpa [#allocation4], 0  ;;  %v197_v10 = vpack.c.bf16 %v27_v9, %v26_v8  ;;  %v28_v11 = vld [vmem:[%s333_s1 + $0x30] sm:$0xff]  ;;  %v29_v12 = vld [vmem:[%s333_s1 + $0x38] sm:$0xff]  ;;  %s245_s21 = smov [#allocation3]  }
   0x7   :  { %v200_v13 = vpack.c.bf16 %v29_v12, %v28_v11  ;;  %v30_v14 = vld [vmem:[%s333_s1 + $0x40] sm:$0xff]  ;;  %v31_v15 = vld [vmem:[%s333_s1 + $0x48] sm:$0xff]  ;;  %v32_v17 = vld [vmem:[%s333_s1 + $0x50] sm:$0xff]  ;;  %s129_s22 = sshll.u32 %s245_s21, 4  ;;  %s130_s22 = int_to_ptr.vmem [resolvable:$true] %s129_s22 }
   0x8   :  { %195 = vmatpush3.bf16.msra.mxu0 %v194_v7  ;;  %v203_v16 = vpack.c.bf16 %v31_v15, %v30_v14  ;;  %v33_v18 = vld [vmem:[%s333_s1 + $0x58] sm:$0xff]  ;;  %v34_v20 = vld [vmem:[%s333_s1 + $0x60] sm:$0xff]  ;;  %v35_v21 = vld [vmem:[%s333_s1 + $0x68] sm:$0xff]  ;;  %p223_p1 = scmp.lt.s32.totalorder %s130_s22, %s130_s22 }
   0x9   :  { %196 = vmatprep.subr.bf16.mxu0 %v242_v3  ;;  %v206_v19 = vpack.c.bf16 %v33_v18, %v32_v17  ;;  %v209_v22 = vpack.c.bf16 %v35_v21, %v34_v20  ;;  %v36_v23 = vld [vmem:[%s333_s1 + $0x70] sm:$0xff]  ;;  %v37_v24 = vld [vmem:[%s333_s1 + $0x78] sm:$0xff]  ;;  %v21_v26 = vld [vmem:[%s332_s0] sm:$0xff]  ;;  %s218_s1 = scalar_lea.vmem %s130_s22, 128 }
   0xa   :  { %v212_v25 = vpack.c.bf16 %v37_v24, %v36_v23  ;;  %v137_v27 = vld [vmem:[%s334_s2] ss:$0 sm:$0xff]  ;;  %p219_p0 = scmp.ne.s32.totalorder %s130_s22, %s218_s1  ;;  %p224_p2 = scmp.lt.s32.totalorder %s218_s1, %s218_s1 }
   0xc   :  { %198 = vmatpush3.bf16.msra.mxu0 %v197_v10  ;;  %p225_p3 = por %p224_p2, %p223_p1 }
   0xd   :  { %199 = vmatprep.subr.bf16.mxu0 %v242_v3 }
   0xe   :  { %p226_p4 = pnand %p225_p3, %p219_p0 }
  0x10   :  { %201 = vmatpush3.bf16.msra.mxu0 %v200_v13 }
  0x11   :  { %202 = vmatprep.subr.bf16.mxu0 %v242_v3 }
  0x14   :  { %204 = vmatpush3.bf16.msra.mxu0 %v203_v16 }
  0x15   :  { %205 = vmatprep.subr.bf16.mxu0 %v242_v3 }
  0x18   :  { %207 = vmatpush3.bf16.msra.mxu0 %v206_v19 }
  0x19   :  { %208 = vmatprep.subr.bf16.mxu0 %v242_v3 }
  0x1c   :  { %210 = vmatpush3.bf16.msra.mxu0 %v209_v22 }
  0x1d   :  { %211 = vmatprep.subr.bf16.mxu0 %v242_v3 }
  0x20   :  { %213 = vmatpush3.bf16.msra.mxu0 %v212_v25 }
  0x23   :  { %188 = vmatmul.mubr.f32.vlgmr.msra.gmra.mrb[0].mxu0 %v21_v26 }
  0xf6   :  { %v104_v28 = vpop.f32.mrb[0].mxu0 }
  0xf7   :  { %v121_v29 = vadd.f32 %v137_v27, %v104_v28  ;;  %v189_v30 = vpop.f32.mrb[1].mxu0 }
  0xf9   :  { %122 = vst [vmem:[#allocation3] sm:$0xff] %v121_v29 }
  0xfa   :  { %229 = shalt.err (!%p226_p4)
}
  0xfb   :  { %s230_s24 = scalar_lea.hbm %s335_s3, 128 }
  0xfc   :  { %p231_p5 = scmp.ne.s32.totalorder %s335_s3, %s230_s24  ;;  %p234_p6 = scmp.lt.u32.totalorder %s230_s24, %s335_s3 }
  0xfe   :  { %p236_p7 = pnand %p234_p6, %p231_p5 }
 0x100   :  { %239 = shalt.err (!%p236_p7)
}
 0x101   :  { %132 = dma.vmem_to_hbm [thread:$0]  %s130_s22, 128, %s335_s3, [#allocation4]  }
 0x102   :  { %240 = dma.done.wait [#allocation4], 128  }
 0x103   :  { %241 = vsyncadd [#allocation4], 4294967168 }
 0x104   :  { %136 = vsyncpa [#allocation4], 1 }

</bundles_post_ra>
